<compile_context>
chip_gen: v7x
topology: tpu7x:2x2x1
jax: 0.10.0
libtpu: 0.0.40
codegen_flags: <defaults>
</compile_context>

<pallas_src>
import jax
import jax.numpy as jnp
from jax import lax
from jax.experimental import pallas as pl
from jax.experimental.pallas import tpu as pltpu


def _round_up(x: int, m: int) -> int:
    return ((x + m - 1) // m) * m


def mlp_kernel(ids_ref, m_ref, b1_ref, w2_ref, b2_ref, o_ref):
    """One batch tile: fused (embedding∘fc1) + ReLU + fc2.

    ids_ref : (tm, S)      int32 token ids
    m_ref   : (S, Vp, Hp)  f32 folded weight  M[s] = emb_table @ W1[s]
    b1_ref  : (1, Hp)      f32
    w2_ref  : (Hp, Op)     f32
    b2_ref  : (1, Op)      f32
    o_ref   : (tm, Op)     f32
    """
    tm, S = ids_ref.shape
    Vp = m_ref.shape[1]
    Hp = b1_ref.shape[1]

    # Hoisted iota used by every position's one-hot (VPU work only).
    col = lax.broadcasted_iota(jnp.int32, (tm, Vp), 1)

    # hidden pre-activation accumulated per token position; exactly one MXU
    # matmul per position thanks to the table@W1 fold done in the wrapper.
    acc = jnp.zeros((tm, Hp), jnp.float32) + b1_ref[...]
    for s in range(S):  # S is small and static (10) -> fully unrolled
        one_hot = (ids_ref[:, s:s + 1] == col).astype(jnp.float32)
        acc = acc + jnp.dot(one_hot, m_ref[s], preferred_element_type=jnp.float32)

    h = jnp.maximum(acc, 0.0)
    out = jnp.dot(h, w2_ref[...], preferred_element_type=jnp.float32) + b2_ref[...]
    o_ref[...] = out.astype(o_ref.dtype)


def mlp_forward(token_ids, emb_table, w1, b1, w2, b2, *, block_b=128):
    """token_ids: (B, S) int ids.  w1: (S*D, H), w2: (H, O) (already transposed
    from PyTorch's (out, in) layout).  Returns (B, O) float32."""
    B, S = token_ids.shape
    V, D = emb_table.shape
    K, H = w1.shape
    H2, O = w2.shape
    assert K == S * D and H2 == H

    # Lane-dense / sublane-dense padding.
    Vp = _round_up(V, 128)
    Hp = _round_up(H, 128)
    Op = _round_up(O, 128)
    tm = min(block_b, _round_up(B, 8))
    Bp = _round_up(B, tm)

    ids_p = jnp.pad(token_ids.astype(jnp.int32), ((0, Bp - B), (0, 0)))

    # Fold embedding table into fc1 (weight-only, O(S*V*D*H) flops, done once
    # per call; batch-sized gather work is removed from the kernel).
    w1_r = w1.astype(jnp.float32).reshape(S, D, H)
    m = jnp.einsum('vd,sdh->svh', emb_table.astype(jnp.float32), w1_r)
    m_p = jnp.pad(m, ((0, 0), (0, Vp - V), (0, Hp - H)))

    b1_p = jnp.pad(b1.astype(jnp.float32).reshape(1, H), ((0, 0), (0, Hp - H)))
    w2_p = jnp.pad(w2.astype(jnp.float32), ((0, Hp - H), (0, Op - O)))
    b2_p = jnp.pad(b2.astype(jnp.float32).reshape(1, O), ((0, 0), (0, Op - O)))

    flops = 2 * Bp * S * Vp * Hp + 2 * Bp * Hp * Op
    bytes_accessed = 4 * (ids_p.size + m_p.size + b1_p.size + w2_p.size
                          + b2_p.size + Bp * Op)

    out = pl.pallas_call(
        mlp_kernel,
        out_shape=jax.ShapeDtypeStruct((Bp, Op), jnp.float32),
        grid=(Bp // tm,),
        in_specs=[
            pl.BlockSpec((tm, S), lambda i: (i, 0)),          # ids: tiled over batch
            pl.BlockSpec((S, Vp, Hp), lambda i: (0, 0, 0)),   # weights: VMEM-resident
            pl.BlockSpec((1, Hp), lambda i: (0, 0)),
            pl.BlockSpec((Hp, Op), lambda i: (0, 0)),
            pl.BlockSpec((1, Op), lambda i: (0, 0)),
        ],
        out_specs=pl.BlockSpec((tm, Op), lambda i: (i, 0)),
        compiler_params=pltpu.CompilerParams(
            dimension_semantics=("parallel",)),
        cost_estimate=pl.CostEstimate(
            flops=flops, transcendentals=0, bytes_accessed=bytes_accessed),
    )(ids_p, m_p, b1_p, w2_p, b2_p)

    return out[:B, :O]


if __name__ == "__main__":
    # Small, deterministic configuration consistent with the module.
    vocab_size = 32          # len(vocab)
    embedding_dim = 50
    hidden_dim = 100
    output_dim = vocab_size
    seq_len = 10             # fc1 input = embedding_dim * 10
    batch = 2

    key = jax.random.PRNGKey(0)
    k_ids, k_emb, k_w1, k_b1, k_w2, k_b2 = jax.random.split(key, 6)

    token_ids = jax.random.randint(k_ids, (batch, seq_len), 0, vocab_size,
                                   dtype=jnp.int32)

    # Deterministic parameter init (shapes from __init__; synthetic values).
    emb_table = jax.random.normal(k_emb, (vocab_size, embedding_dim), jnp.float32)
    fan_in1 = embedding_dim * seq_len
    w1 = jax.random.uniform(k_w1, (fan_in1, hidden_dim), jnp.float32,
                            -1.0 / jnp.sqrt(fan_in1), 1.0 / jnp.sqrt(fan_in1))
    b1 = jax.random.uniform(k_b1, (hidden_dim,), jnp.float32,
                            -1.0 / jnp.sqrt(fan_in1), 1.0 / jnp.sqrt(fan_in1))
    w2 = jax.random.uniform(k_w2, (hidden_dim, output_dim), jnp.float32,
                            -1.0 / jnp.sqrt(hidden_dim), 1.0 / jnp.sqrt(hidden_dim))
    b2 = jax.random.uniform(k_b2, (output_dim,), jnp.float32,
                            -1.0 / jnp.sqrt(hidden_dim), 1.0 / jnp.sqrt(hidden_dim))

    out = jax.jit(mlp_forward)(token_ids, emb_table, w1, b1, w2, b2)
    out = jax.block_until_ready(out)

    # Pure-JAX reference (same math as the torch forward).
    emb = jnp.take(emb_table, token_ids, axis=0).reshape(batch, -1)
    ref = jnp.maximum(emb @ w1 + b1, 0.0) @ w2 + b2
    assert out.shape == (batch, output_dim)
    assert jnp.allclose(out, ref, atol=1e-3, rtol=1e-3), \
        f"max abs err = {jnp.max(jnp.abs(out - ref))}"

    print("KERNEL_OK")
</pallas_src>

<mosaic_0001>
module attributes {stable_mosaic.version = 11 : i64} {
  func.func @mlp_kernel(%arg0: i32, %arg1: memref<8x10xi32, #tpu.memory_space<vmem>>, %arg2: memref<10x128x128xf32, #tpu.memory_space<vmem>>, %arg3: memref<1x128xf32, #tpu.memory_space<vmem>>, %arg4: memref<128x128xf32, #tpu.memory_space<vmem>>, %arg5: memref<1x128xf32, #tpu.memory_space<vmem>>, %arg6: memref<8x128xf32, #tpu.memory_space<vmem>>) attributes {dimension_semantics = [#tpu.dimension_semantics<parallel>], iteration_bounds = array<i64: 1>, scalar_prefetch = 0 : i64, scratch_operands = 0 : i64, tpu.core_type = #tpu.core_type<tc>, window_params = [{transform_indices = @transform_0, window_bounds = array<i64: 8, 10>}, {pipeline_mode = #tpu.pipeline_mode<synchronous>, transform_indices = @transform_1, window_bounds = array<i64: 10, 128, 128>}, {pipeline_mode = #tpu.pipeline_mode<synchronous>, transform_indices = @transform_2, window_bounds = array<i64: 1, 128>}, {pipeline_mode = #tpu.pipeline_mode<synchronous>, transform_indices = @transform_3, window_bounds = array<i64: 128, 128>}, {pipeline_mode = #tpu.pipeline_mode<synchronous>, transform_indices = @transform_4, window_bounds = array<i64: 1, 128>}, {transform_indices = @transform_5, window_bounds = array<i64: 8, 128>}]} {
    %0 = tpu.iota {dimensions = array<i32: 1>} : vector<8x128xi32>
    %cst = arith.constant 0.000000e+00 : f32
    %1 = vector.broadcast %cst : f32 to vector<8x128xf32>
    %c0 = arith.constant 0 : index
    %c0_0 = arith.constant 0 : index
    %2 = vector.load %arg3[%c0, %c0_0] : memref<1x128xf32, #tpu.memory_space<vmem>>, vector<1x128xf32>
    %3 = vector.broadcast %2 : vector<1x128xf32> to vector<8x128xf32>
    %4 = arith.addf %1, %3 : vector<8x128xf32>
    %c0_1 = arith.constant 0 : index
    %c0_2 = arith.constant 0 : index
    %5 = vector.load %arg1[%c0_1, %c0_2] : memref<8x10xi32, #tpu.memory_space<vmem>>, vector<8x1xi32>
    %6 = vector.broadcast %5 : vector<8x1xi32> to vector<8x128xi32>
    %7 = arith.cmpi eq, %6, %0 : vector<8x128xi32>
    %8 = arith.extui %7 : vector<8x128xi1> to vector<8x128xi32>
    %9 = arith.sitofp %8 : vector<8x128xi32> to vector<8x128xf32>
    %c0_3 = arith.constant 0 : index
    %c0_4 = arith.constant 0 : index
    %c0_5 = arith.constant 0 : index
    %10 = vector.load %arg2[%c0_3, %c0_4, %c0_5] : memref<10x128x128xf32, #tpu.memory_space<vmem>>, vector<1x128x128xf32>
    %11 = vector.shape_cast %10 : vector<1x128x128xf32> to vector<128x128xf32>
    %cst_6 = arith.constant dense<0.000000e+00> : vector<8x128xf32>
    %12 = tpu.matmul %9, %11, %cst_6 {dimension_numbers = #tpu.dot_dimension_numbers<[1], [0], [0], [1], [0, 0, 1, 1], [], []>} : vector<8x128xf32>, vector<128x128xf32>, vector<8x128xf32> -> vector<8x128xf32>
    %13 = arith.addf %4, %12 : vector<8x128xf32>
    %c0_7 = arith.constant 0 : index
    %c1 = arith.constant 1 : index
    %14 = vector.load %arg1[%c0_7, %c1] : memref<8x10xi32, #tpu.memory_space<vmem>>, vector<8x1xi32>
    %15 = vector.broadcast %14 : vector<8x1xi32> to vector<8x128xi32>
    %16 = arith.cmpi eq, %15, %0 : vector<8x128xi32>
    %17 = arith.extui %16 : vector<8x128xi1> to vector<8x128xi32>
    %18 = arith.sitofp %17 : vector<8x128xi32> to vector<8x128xf32>
    %c1_8 = arith.constant 1 : index
    %c0_9 = arith.constant 0 : index
    %c0_10 = arith.constant 0 : index
    %19 = vector.load %arg2[%c1_8, %c0_9, %c0_10] : memref<10x128x128xf32, #tpu.memory_space<vmem>>, vector<1x128x128xf32>
    %20 = vector.shape_cast %19 : vector<1x128x128xf32> to vector<128x128xf32>
    %cst_11 = arith.constant dense<0.000000e+00> : vector<8x128xf32>
    %21 = tpu.matmul %18, %20, %cst_11 {dimension_numbers = #tpu.dot_dimension_numbers<[1], [0], [0], [1], [0, 0, 1, 1], [], []>} : vector<8x128xf32>, vector<128x128xf32>, vector<8x128xf32> -> vector<8x128xf32>
    %22 = arith.addf %13, %21 : vector<8x128xf32>
    %c0_12 = arith.constant 0 : index
    %c2 = arith.constant 2 : index
    %23 = vector.load %arg1[%c0_12, %c2] : memref<8x10xi32, #tpu.memory_space<vmem>>, vector<8x1xi32>
    %24 = vector.broadcast %23 : vector<8x1xi32> to vector<8x128xi32>
    %25 = arith.cmpi eq, %24, %0 : vector<8x128xi32>
    %26 = arith.extui %25 : vector<8x128xi1> to vector<8x128xi32>
    %27 = arith.sitofp %26 : vector<8x128xi32> to vector<8x128xf32>
    %c2_13 = arith.constant 2 : index
    %c0_14 = arith.constant 0 : index
    %c0_15 = arith.constant 0 : index
    %28 = vector.load %arg2[%c2_13, %c0_14, %c0_15] : memref<10x128x128xf32, #tpu.memory_space<vmem>>, vector<1x128x128xf32>
    %29 = vector.shape_cast %28 : vector<1x128x128xf32> to vector<128x128xf32>
    %cst_16 = arith.constant dense<0.000000e+00> : vector<8x128xf32>
    %30 = tpu.matmul %27, %29, %cst_16 {dimension_numbers = #tpu.dot_dimension_numbers<[1], [0], [0], [1], [0, 0, 1, 1], [], []>} : vector<8x128xf32>, vector<128x128xf32>, vector<8x128xf32> -> vector<8x128xf32>
    %31 = arith.addf %22, %30 : vector<8x128xf32>
    %c0_17 = arith.constant 0 : index
    %c3 = arith.constant 3 : index
    %32 = vector.load %arg1[%c0_17, %c3] : memref<8x10xi32, #tpu.memory_space<vmem>>, vector<8x1xi32>
    %33 = vector.broadcast %32 : vector<8x1xi32> to vector<8x128xi32>
    %34 = arith.cmpi eq, %33, %0 : vector<8x128xi32>
    %35 = arith.extui %34 : vector<8x128xi1> to vector<8x128xi32>
    %36 = arith.sitofp %35 : vector<8x128xi32> to vector<8x128xf32>
    %c3_18 = arith.constant 3 : index
    %c0_19 = arith.constant 0 : index
    %c0_20 = arith.constant 0 : index
    %37 = vector.load %arg2[%c3_18, %c0_19, %c0_20] : memref<10x128x128xf32, #tpu.memory_space<vmem>>, vector<1x128x128xf32>
    %38 = vector.shape_cast %37 : vector<1x128x128xf32> to vector<128x128xf32>
    %cst_21 = arith.constant dense<0.000000e+00> : vector<8x128xf32>
    %39 = tpu.matmul %36, %38, %cst_21 {dimension_numbers = #tpu.dot_dimension_numbers<[1], [0], [0], [1], [0, 0, 1, 1], [], []>} : vector<8x128xf32>, vector<128x128xf32>, vector<8x128xf32> -> vector<8x128xf32>
    %40 = arith.addf %31, %39 : vector<8x128xf32>
    %c0_22 = arith.constant 0 : index
    %c4 = arith.constant 4 : index
    %41 = vector.load %arg1[%c0_22, %c4] : memref<8x10xi32, #tpu.memory_space<vmem>>, vector<8x1xi32>
    %42 = vector.broadcast %41 : vector<8x1xi32> to vector<8x128xi32>
    %43 = arith.cmpi eq, %42, %0 : vector<8x128xi32>
    %44 = arith.extui %43 : vector<8x128xi1> to vector<8x128xi32>
    %45 = arith.sitofp %44 : vector<8x128xi32> to vector<8x128xf32>
    %c4_23 = arith.constant 4 : index
    %c0_24 = arith.constant 0 : index
    %c0_25 = arith.constant 0 : index
    %46 = vector.load %arg2[%c4_23, %c0_24, %c0_25] : memref<10x128x128xf32, #tpu.memory_space<vmem>>, vector<1x128x128xf32>
    %47 = vector.shape_cast %46 : vector<1x128x128xf32> to vector<128x128xf32>
    %cst_26 = arith.constant dense<0.000000e+00> : vector<8x128xf32>
    %48 = tpu.matmul %45, %47, %cst_26 {dimension_numbers = #tpu.dot_dimension_numbers<[1], [0], [0], [1], [0, 0, 1, 1], [], []>} : vector<8x128xf32>, vector<128x128xf32>, vector<8x128xf32> -> vector<8x128xf32>
    %49 = arith.addf %40, %48 : vector<8x128xf32>
    %c0_27 = arith.constant 0 : index
    %c5 = arith.constant 5 : index
    %50 = vector.load %arg1[%c0_27, %c5] : memref<8x10xi32, #tpu.memory_space<vmem>>, vector<8x1xi32>
    %51 = vector.broadcast %50 : vector<8x1xi32> to vector<8x128xi32>
    %52 = arith.cmpi eq, %51, %0 : vector<8x128xi32>
    %53 = arith.extui %52 : vector<8x128xi1> to vector<8x128xi32>
    %54 = arith.sitofp %53 : vector<8x128xi32> to vector<8x128xf32>
    %c5_28 = arith.constant 5 : index
    %c0_29 = arith.constant 0 : index
    %c0_30 = arith.constant 0 : index
    %55 = vector.load %arg2[%c5_28, %c0_29, %c0_30] : memref<10x128x128xf32, #tpu.memory_space<vmem>>, vector<1x128x128xf32>
    %56 = vector.shape_cast %55 : vector<1x128x128xf32> to vector<128x128xf32>
    %cst_31 = arith.constant dense<0.000000e+00> : vector<8x128xf32>
    %57 = tpu.matmul %54, %56, %cst_31 {dimension_numbers = #tpu.dot_dimension_numbers<[1], [0], [0], [1], [0, 0, 1, 1], [], []>} : vector<8x128xf32>, vector<128x128xf32>, vector<8x128xf32> -> vector<8x128xf32>
    %58 = arith.addf %49, %57 : vector<8x128xf32>
    %c0_32 = arith.constant 0 : index
    %c6 = arith.constant 6 : index
    %59 = vector.load %arg1[%c0_32, %c6] : memref<8x10xi32, #tpu.memory_space<vmem>>, vector<8x1xi32>
    %60 = vector.broadcast %59 : vector<8x1xi32> to vector<8x128xi32>
    %61 = arith.cmpi eq, %60, %0 : vector<8x128xi32>
    %62 = arith.extui %61 : vector<8x128xi1> to vector<8x128xi32>
    %63 = arith.sitofp %62 : vector<8x128xi32> to vector<8x128xf32>
    %c6_33 = arith.constant 6 : index
    %c0_34 = arith.constant 0 : index
    %c0_35 = arith.constant 0 : index
    %64 = vector.load %arg2[%c6_33, %c0_34, %c0_35] : memref<10x128x128xf32, #tpu.memory_space<vmem>>, vector<1x128x128xf32>
    %65 = vector.shape_cast %64 : vector<1x128x128xf32> to vector<128x128xf32>
    %cst_36 = arith.constant dense<0.000000e+00> : vector<8x128xf32>
    %66 = tpu.matmul %63, %65, %cst_36 {dimension_numbers = #tpu.dot_dimension_numbers<[1], [0], [0], [1], [0, 0, 1, 1], [], []>} : vector<8x128xf32>, vector<128x128xf32>, vector<8x128xf32> -> vector<8x128xf32>
    %67 = arith.addf %58, %66 : vector<8x128xf32>
    %c0_37 = arith.constant 0 : index
    %c7 = arith.constant 7 : index
    %68 = vector.load %arg1[%c0_37, %c7] : memref<8x10xi32, #tpu.memory_space<vmem>>, vector<8x1xi32>
    %69 = vector.broadcast %68 : vector<8x1xi32> to vector<8x128xi32>
    %70 = arith.cmpi eq, %69, %0 : vector<8x128xi32>
    %71 = arith.extui %70 : vector<8x128xi1> to vector<8x128xi32>
    %72 = arith.sitofp %71 : vector<8x128xi32> to vector<8x128xf32>
    %c7_38 = arith.constant 7 : index
    %c0_39 = arith.constant 0 : index
    %c0_40 = arith.constant 0 : index
    %73 = vector.load %arg2[%c7_38, %c0_39, %c0_40] : memref<10x128x128xf32, #tpu.memory_space<vmem>>, vector<1x128x128xf32>
    %74 = vector.shape_cast %73 : vector<1x128x128xf32> to vector<128x128xf32>
    %cst_41 = arith.constant dense<0.000000e+00> : vector<8x128xf32>
    %75 = tpu.matmul %72, %74, %cst_41 {dimension_numbers = #tpu.dot_dimension_numbers<[1], [0], [0], [1], [0, 0, 1, 1], [], []>} : vector<8x128xf32>, vector<128x128xf32>, vector<8x128xf32> -> vector<8x128xf32>
    %76 = arith.addf %67, %75 : vector<8x128xf32>
    %c0_42 = arith.constant 0 : index
    %c8 = arith.constant 8 : index
    %77 = vector.load %arg1[%c0_42, %c8] : memref<8x10xi32, #tpu.memory_space<vmem>>, vector<8x1xi32>
    %78 = vector.broadcast %77 : vector<8x1xi32> to vector<8x128xi32>
    %79 = arith.cmpi eq, %78, %0 : vector<8x128xi32>
    %80 = arith.extui %79 : vector<8x128xi1> to vector<8x128xi32>
    %81 = arith.sitofp %80 : vector<8x128xi32> to vector<8x128xf32>
    %c8_43 = arith.constant 8 : index
    %c0_44 = arith.constant 0 : index
    %c0_45 = arith.constant 0 : index
    %82 = vector.load %arg2[%c8_43, %c0_44, %c0_45] : memref<10x128x128xf32, #tpu.memory_space<vmem>>, vector<1x128x128xf32>
    %83 = vector.shape_cast %82 : vector<1x128x128xf32> to vector<128x128xf32>
    %cst_46 = arith.constant dense<0.000000e+00> : vector<8x128xf32>
    %84 = tpu.matmul %81, %83, %cst_46 {dimension_numbers = #tpu.dot_dimension_numbers<[1], [0], [0], [1], [0, 0, 1, 1], [], []>} : vector<8x128xf32>, vector<128x128xf32>, vector<8x128xf32> -> vector<8x128xf32>
    %85 = arith.addf %76, %84 : vector<8x128xf32>
    %c0_47 = arith.constant 0 : index
    %c9 = arith.constant 9 : index
    %86 = vector.load %arg1[%c0_47, %c9] : memref<8x10xi32, #tpu.memory_space<vmem>>, vector<8x1xi32>
    %87 = vector.broadcast %86 : vector<8x1xi32> to vector<8x128xi32>
    %88 = arith.cmpi eq, %87, %0 : vector<8x128xi32>
    %89 = arith.extui %88 : vector<8x128xi1> to vector<8x128xi32>
    %90 = arith.sitofp %89 : vector<8x128xi32> to vector<8x128xf32>
    %c9_48 = arith.constant 9 : index
    %c0_49 = arith.constant 0 : index
    %c0_50 = arith.constant 0 : index
    %91 = vector.load %arg2[%c9_48, %c0_49, %c0_50] : memref<10x128x128xf32, #tpu.memory_space<vmem>>, vector<1x128x128xf32>
    %92 = vector.shape_cast %91 : vector<1x128x128xf32> to vector<128x128xf32>
    %cst_51 = arith.constant dense<0.000000e+00> : vector<8x128xf32>
    %93 = tpu.matmul %90, %92, %cst_51 {dimension_numbers = #tpu.dot_dimension_numbers<[1], [0], [0], [1], [0, 0, 1, 1], [], []>} : vector<8x128xf32>, vector<128x128xf32>, vector<8x128xf32> -> vector<8x128xf32>
    %94 = arith.addf %85, %93 : vector<8x128xf32>
    %cst_52 = arith.constant 0.000000e+00 : f32
    %95 = vector.broadcast %cst_52 : f32 to vector<8x128xf32>
    %96 = arith.maximumf %94, %95 : vector<8x128xf32>
    %c0_53 = arith.constant 0 : index
    %c0_54 = arith.constant 0 : index
    %97 = vector.load %arg4[%c0_53, %c0_54] : memref<128x128xf32, #tpu.memory_space<vmem>>, vector<128x128xf32>
    %cst_55 = arith.constant dense<0.000000e+00> : vector<8x128xf32>
    %98 = tpu.matmul %96, %97, %cst_55 {dimension_numbers = #tpu.dot_dimension_numbers<[1], [0], [0], [1], [0, 0, 1, 1], [], []>} : vector<8x128xf32>, vector<128x128xf32>, vector<8x128xf32> -> vector<8x128xf32>
    %c0_56 = arith.constant 0 : index
    %c0_57 = arith.constant 0 : index
    %99 = vector.load %arg5[%c0_56, %c0_57] : memref<1x128xf32, #tpu.memory_space<vmem>>, vector<1x128xf32>
    %100 = vector.broadcast %99 : vector<1x128xf32> to vector<8x128xf32>
    %101 = arith.addf %98, %100 : vector<8x128xf32>
    %c0_58 = arith.constant 0 : index
    %c0_59 = arith.constant 0 : index
    %102 = vector.load %arg6[%c0_58, %c0_59] : memref<8x128xf32, #tpu.memory_space<vmem>>, vector<8x128xf32>
    tpu.vector_store %arg6[%c0_58, %c0_59], %101 {strides = array<i32>} : memref<8x128xf32, #tpu.memory_space<vmem>>, vector<8x128xf32>,
    return
  }
  func.func @transform_0(%arg0: i32) -> (i32, i32) {
    %c0_i32 = arith.constant 0 : i32
    %c0_i32_0 = arith.constant 0 : i32
    return %arg0, %c0_i32 : i32, i32
  }
  func.func @transform_1(%arg0: i32) -> (i32, i32, i32) {
    %c0_i32 = arith.constant 0 : i32
    %c0_i32_0 = arith.constant 0 : i32
    %c0_i32_1 = arith.constant 0 : i32
    %c0_i32_2 = arith.constant 0 : i32
    return %c0_i32, %c0_i32_0, %c0_i32_1 : i32, i32, i32
  }
  func.func @transform_2(%arg0: i32) -> (i32, i32) {
    %c0_i32 = arith.constant 0 : i32
    %c0_i32_0 = arith.constant 0 : i32
    %c0_i32_1 = arith.constant 0 : i32
    return %c0_i32, %c0_i32_0 : i32, i32
  }
  func.func @transform_3(%arg0: i32) -> (i32, i32) {
    %c0_i32 = arith.constant 0 : i32
    %c0_i32_0 = arith.constant 0 : i32
    %c0_i32_1 = arith.constant 0 : i32
    return %c0_i32, %c0_i32_0 : i32, i32
  }
  func.func @transform_4(%arg0: i32) -> (i32, i32) {
    %c0_i32 = arith.constant 0 : i32
    %c0_i32_0 = arith.constant 0 : i32
    %c0_i32_1 = arith.constant 0 : i32
    return %c0_i32, %c0_i32_0 : i32, i32
  }
  func.func @transform_5(%arg0: i32) -> (i32, i32) {
    %c0_i32 = arith.constant 0 : i32
    %c0_i32_0 = arith.constant 0 : i32
    return %arg0, %c0_i32 : i32, i32
  }
}

</mosaic_0001>

<bundles_post_ra>
// kernel: mlp_forward.1
= control target key start
LH: loop header
LB: loop body
LE: loop exit
PB: predicated region body
PF: predicated region fallthrough
CT: control target
= control target key end

     0   :  { %v2114_v0 = vmov 4   ;;  %v2115_v1 = vmov 0   ;;  %v2116_v7 = vmov 0.0|0.0   ;;  %vm2117_vm0 = vmmov 0   ;;  %s2845_s0 = inlined_call_operand.vmem [shape: s32[8,10], index: 0, kind: input, shape index: {}]   ;;  %s2846_s1 = inlined_call_operand.vmem [shape: f32[10,128,128], index: 1, kind: input, shape index: {}]   ;;  %s2847_s3 = inlined_call_operand.vmem [shape: f32[128,128], index: 3, kind: input, shape index: {}]   ;;  %s2848_s2 = inlined_call_operand.vmem [shape: f32[1,128], index: 2, kind: input, shape index: {}]   ;;  %s2849_s4 = inlined_call_operand.vmem [shape: f32[1,128], index: 4, kind: input, shape index: {}]   ;;  %s2850_s5 = inlined_call_operand.vmem [shape: f32[8,128], index: 5, kind: output, shape index: {}]  }
   0x1   :  { %2103 = vset.pattern.permute.xlu0 %v2114_v0  ;;  %2105 = vset.pattern.permute.xlu1 %v2115_v1  ;;  %v2161_v2 = vld [vmem:[%s2845_s0] sm:$0xff]  ;;  %v38_v4 = vld [vmem:[%s2846_s1 + $0x8] sm:$0xff]  ;;  %v39_v10 = vld [vmem:[%s2846_s1 + $0x10] sm:$0xff]  ;;  %v2118_v14 = vmov 0.0   ;;  %v2119_v18 = vmov 6   ;;  %v2120_v19 = vmov 5   ;;  %v20_v61 = vlaneseq }
   0x2   :  { %v37_v3 = vld [vmem:[%s2846_s1] sm:$0xff]  ;;  %32 = vperm.xlu1 %2105, %v2161_v2   ;;  %407 = vperm.xlu0 %2103, %v2161_v2   ;;  %v1128_v6 = vld [vmem:[%s2846_s1 + $0x208] sm:$0xff]  ;;  %v40_v11 = vld [vmem:[%s2846_s1 + $0x18] sm:$0xff]  ;;  %v2121_v26 = vmov 1   ;;  %v2122_v27 = vmov 7   ;;  %v2123_v37 = vmov 2  }
   0x3   :  { %v1127_v5 = vld [vmem:[%s2846_s1 + $0x200] sm:$0xff]  ;;  %1807 = vmatprep.subr.bf16.mxu1 %v2116_v7  ;;  %1903 = vmatprep.subr.bf16.mxu0 %v2116_v7  ;;  %v1808_v8 = vpack.c.bf16 %v38_v4, %v37_v3  ;;  %v1129_v12 = vld [vmem:[%s2846_s1 + $0x210] sm:$0xff]  ;;  %v1130_v13 = vld [vmem:[%s2846_s1 + $0x218] sm:$0xff]  ;;  %v1811_v15 = vpack.c.bf16 %v40_v11, %v39_v10  ;;  %v2124_v38 = vmov 3   ;;  %v2125_v45 = vmov 8  }
   0x4   :  { %v1904_v9 = vpack.c.bf16 %v1128_v6, %v1127_v5  ;;  %1454 = vmatprep.mubr.msk.f32.mxu1 %vm2117_vm0, %v2118_v14  ;;  %1594 = vmatprep.mubr.msk.f32.mxu0 %vm2117_vm0, %v2118_v14  ;;  %v1907_v16 = vpack.c.bf16 %v1130_v13, %v1129_v12  ;;  %v41_v17 = vld [vmem:[%s2846_s1 + $0x20] sm:$0xff]  ;;  %v42_v20 = vld [vmem:[%s2846_s1 + $0x28] sm:$0xff]  ;;  %v43_v25 = vld [vmem:[%s2846_s1 + $0x30] sm:$0xff]  ;;  %v2126_v60 = vmov 9   ;;  %v2303_v3 = vand.u32 127, %v20_v61 }
   0x5   :  { %1809 = vmatpush3.bf16.msra.mxu1 %v1808_v8  ;;  %v1131_v21 = vld [vmem:[%s2846_s1 + $0x220] sm:$0xff]  ;;  %v1132_v22 = vld [vmem:[%s2846_s1 + $0x228] sm:$0xff]  ;;  %v1814_v23 = vpack.c.bf16 %v42_v20, %v41_v17  ;;  %v44_v28 = vld [vmem:[%s2846_s1 + $0x38] sm:$0xff]  ;;  %v2127_v12 = vmov 1.0  }
   0x6   :  { %1905 = vmatpush3.bf16.msra.mxu0 %v1904_v9  ;;  %2106 = vset.pattern.permute.xlu1 %v2119_v18  ;;  %v1910_v24 = vpack.c.bf16 %v1132_v22, %v1131_v21  ;;  %v1133_v29 = vld [vmem:[%s2846_s1 + $0x230] sm:$0xff]  ;;  %v1134_v30 = vld [vmem:[%s2846_s1 + $0x238] sm:$0xff]  ;;  %v1817_v31 = vpack.c.bf16 %v44_v28, %v43_v25  ;;  %v45_v33 = vld [vmem:[%s2846_s1 + $0x40] sm:$0xff] }
   0x7   :  { %2104 = vset.pattern.permute.xlu0 %v2120_v19  ;;  %595 = vperm.xlu1 %2106, %v2161_v2   ;;  %v1913_v32 = vpack.c.bf16 %v1134_v30, %v1133_v29  ;;  %v46_v34 = vld [vmem:[%s2846_s1 + $0x48] sm:$0xff]  ;;  %v1135_v35 = vld [vmem:[%s2846_s1 + $0x240] sm:$0xff]  ;;  %v47_v41 = vld [vmem:[%s2846_s1 + $0x50] sm:$0xff] }
   0x8   :  { %501 = vperm.xlu0 %2104, %v2161_v2   ;;  %1810 = vmatprep.subr.bf16.mxu1 %v2116_v7  ;;  %v1136_v36 = vld [vmem:[%s2846_s1 + $0x248] sm:$0xff]  ;;  %v1820_v39 = vpack.c.bf16 %v46_v34, %v45_v33  ;;  %v48_v42 = vld [vmem:[%s2846_s1 + $0x58] sm:$0xff]  ;;  %v1137_v43 = vld [vmem:[%s2846_s1 + $0x250] sm:$0xff] }
   0x9   :  { %1906 = vmatprep.subr.bf16.mxu0 %v2116_v7  ;;  %1812 = vmatpush3.bf16.msra.mxu1 %v1811_v15  ;;  %v1916_v40 = vpack.c.bf16 %v1136_v36, %v1135_v35  ;;  %v1138_v44 = vld [vmem:[%s2846_s1 + $0x258] sm:$0xff]  ;;  %v1823_v46 = vpack.c.bf16 %v48_v42, %v47_v41  ;;  %v49_v48 = vld [vmem:[%s2846_s1 + $0x60] sm:$0xff]  ;;  %v50_v49 = vld [vmem:[%s2846_s1 + $0x68] sm:$0xff] }
   0xa   :  { %1908 = vmatpush3.bf16.msra.mxu0 %v1907_v16  ;;  %1813 = vmatprep.subr.bf16.mxu1 %v2116_v7  ;;  %v1919_v47 = vpack.c.bf16 %v1138_v44, %v1137_v43  ;;  %v1139_v50 = vld [vmem:[%s2846_s1 + $0x260] sm:$0xff]  ;;  %v1140_v51 = vld [vmem:[%s2846_s1 + $0x268] sm:$0xff]  ;;  %v1826_v52 = vpack.c.bf16 %v50_v49, %v49_v48  ;;  %v51_v54 = vld [vmem:[%s2846_s1 + $0x70] sm:$0xff] }
   0xb   :  { %1909 = vmatprep.subr.bf16.mxu0 %v2116_v7  ;;  %2107 = vset.pattern.permute.xlu1 %v2121_v26  ;;  %v1922_v53 = vpack.c.bf16 %v1140_v51, %v1139_v50  ;;  %v52_v55 = vld [vmem:[%s2846_s1 + $0x78] sm:$0xff]  ;;  %v1141_v56 = vld [vmem:[%s2846_s1 + $0x270] sm:$0xff]  ;;  %v1073_v62 = vld [vmem:[%s2846_s1 + $0x80] sm:$0xff] }
   0xc   :  { %2108 = vset.pattern.permute.xlu0 %v2122_v27  ;;  %125 = vperm.xlu1 %2107, %v2161_v2   ;;  %v1142_v57 = vld [vmem:[%s2846_s1 + $0x278] sm:$0xff]  ;;  %v1829_v58 = vpack.c.bf16 %v52_v55, %v51_v54  ;;  %v1074_v63 = vld [vmem:[%s2846_s1 + $0x88] sm:$0xff]  ;;  %v1145_v0 = vld [vmem:[%s2846_s1 + $0x280] sm:$0xff] }
   0xd   :  { %689 = vperm.xlu0 %2108, %v2161_v2   ;;  %1815 = vmatpush3.bf16.msra.mxu1 %v1814_v23  ;;  %v1925_v59 = vpack.c.bf16 %v1142_v57, %v1141_v56  ;;  %v1146_v1 = vld [vmem:[%s2846_s1 + $0x288] sm:$0xff]  ;;  %v1075_v5 = vld [vmem:[%s2846_s1 + $0x90] sm:$0xff]  ;;  %v1076_v9 = vld [vmem:[%s2846_s1 + $0x98] sm:$0xff] }
   0xe   :  { %1911 = vmatpush3.bf16.msra.mxu0 %v1910_v24  ;;  %1816 = vmatprep.subr.bf16.mxu1 %v2116_v7  ;;  %v1928_v4 = vpack.c.bf16 %v1146_v1, %v1145_v0  ;;  %v1147_v10 = vld [vmem:[%s2846_s1 + $0x290] sm:$0xff]  ;;  %v1148_v11 = vld [vmem:[%s2846_s1 + $0x298] sm:$0xff]  ;;  %v1835_v13 = vpack.c.bf16 %v1076_v9, %v1075_v5  ;;  %v1077_v16 = vld [vmem:[%s2846_s1 + $0xa0] sm:$0xff] }
   0xf   :  { %1912 = vmatprep.subr.bf16.mxu0 %v2116_v7  ;;  %v1931_v15 = vpack.c.bf16 %v1148_v11, %v1147_v10  ;;  %v1078_v17 = vld [vmem:[%s2846_s1 + $0xa8] sm:$0xff]  ;;  %v1149_v18 = vld [vmem:[%s2846_s1 + $0x2a0] sm:$0xff]  ;;  %v1079_v22 = vld [vmem:[%s2846_s1 + $0xb0] sm:$0xff] }
  0x10   :  { %2109 = vset.pattern.permute.xlu1 %v2123_v37  ;;  %v1150_v19 = vld [vmem:[%s2846_s1 + $0x2a8] sm:$0xff]  ;;  %v1838_v20 = vpack.c.bf16 %v1078_v17, %v1077_v16  ;;  %v1080_v23 = vld [vmem:[%s2846_s1 + $0xb8] sm:$0xff]  ;;  %v1151_v24 = vld [vmem:[%s2846_s1 + $0x2b0] sm:$0xff] }
  0x11   :  { %2111 = vset.pattern.permute.xlu0 %v2124_v38  ;;  %219 = vperm.xlu1 %2109, %v2161_v2   ;;  %v1934_v21 = vpack.c.bf16 %v1150_v19, %v1149_v18  ;;  %v1152_v25 = vld [vmem:[%s2846_s1 + $0x2b8] sm:$0xff]  ;;  %v1841_v26 = vpack.c.bf16 %v1080_v23, %v1079_v22  ;;  %v1081_v28 = vld [vmem:[%s2846_s1 + $0xc0] sm:$0xff]  ;;  %v1082_v29 = vld [vmem:[%s2846_s1 + $0xc8] sm:$0xff] }
  0x12   :  { %313 = vperm.xlu0 %2111, %v2161_v2   ;;  %1818 = vmatpush3.bf16.msra.mxu1 %v1817_v31  ;;  %v1937_v27 = vpack.c.bf16 %v1152_v25, %v1151_v24  ;;  %v1153_v30 = vld [vmem:[%s2846_s1 + $0x2c0] sm:$0xff]  ;;  %v1154_v31 = vld [vmem:[%s2846_s1 + $0x2c8] sm:$0xff]  ;;  %v1083_v34 = vld [vmem:[%s2846_s1 + $0xd0] sm:$0xff] }
  0x13   :  { %1914 = vmatpush3.bf16.msra.mxu0 %v1913_v32  ;;  %1819 = vmatprep.subr.bf16.mxu1 %v2116_v7  ;;  %v1844_v32 = vpack.c.bf16 %v1082_v29, %v1081_v28  ;;  %v1940_v33 = vpack.c.bf16 %v1154_v31, %v1153_v30  ;;  %v1084_v35 = vld [vmem:[%s2846_s1 + $0xd8] sm:$0xff]  ;;  %v1155_v36 = vld [vmem:[%s2846_s1 + $0x2d0] sm:$0xff]  ;;  %v1086_v41 = vld [vmem:[%s2846_s1 + $0xe8] sm:$0xff] }
  0x14   :  { %1915 = vmatprep.subr.bf16.mxu0 %v2116_v7  ;;  %v1156_v37 = vld [vmem:[%s2846_s1 + $0x2d8] sm:$0xff]  ;;  %v1847_v38 = vpack.c.bf16 %v1084_v35, %v1083_v34  ;;  %v1157_v42 = vld [vmem:[%s2846_s1 + $0x2e0] sm:$0xff]  ;;  %v1158_v43 = vld [vmem:[%s2846_s1 + $0x2e8] sm:$0xff] }
  0x15   :  { %2110 = vset.pattern.permute.xlu1 %v2125_v45  ;;  %v1088_v48 = vld [vmem:[%s2846_s1 + $0xf8] sm:$0xff]  ;;  %v1159_v49 = vld [vmem:[%s2846_s1 + $0x2f0] sm:$0xff]  ;;  %v1092_v54 = vld [vmem:[%s2846_s1 + $0x108] sm:$0xff] }
  0x16   :  { %1821 = vmatpush3.bf16.msra.mxu1 %v1820_v39  ;;  %783 = vperm.xlu1 %2110, %v2161_v2   ;;  %v1943_v39 = vpack.c.bf16 %v1156_v37, %v1155_v36  ;;  %v1160_v50 = vld [vmem:[%s2846_s1 + $0x2f8] sm:$0xff]  ;;  %v1163_v57 = vld [vmem:[%s2846_s1 + $0x300] sm:$0xff]  ;;  %v1093_v61 = vld [vmem:[%s2846_s1 + $0x110] sm:$0xff] }
  0x17   :  { %1917 = vmatpush3.bf16.msra.mxu0 %v1916_v40  ;;  %1822 = vmatprep.subr.bf16.mxu1 %v2116_v7  ;;  %v1085_v40 = vld [vmem:[%s2846_s1 + $0xe0] sm:$0xff]  ;;  %v1166_v0 = vld [vmem:[%s2846_s1 + $0x318] sm:$0xff]  ;;  %v1096_v5 = vld [vmem:[%s2846_s1 + $0x128] sm:$0xff] }
  0x18   :  { %1918 = vmatprep.subr.bf16.mxu0 %v2116_v7  ;;  %2113 = vset.pattern.permute.xlu0 %v2126_v60  ;;  %v1850_v45 = vpack.c.bf16 %v1086_v41, %v1085_v40  ;;  %v1097_v11 = vld [vmem:[%s2846_s1 + $0x130] sm:$0xff]  ;;  %v1170_v16 = vld [vmem:[%s2846_s1 + $0x338] sm:$0xff]  ;;  %v1099_v19 = vld [vmem:[%s2846_s1 + $0x140] sm:$0xff] }
  0x19   :  { %v1172_v22 = vld [vmem:[%s2846_s1 + $0x348] sm:$0xff]  ;;  %v1101_v25 = vld [vmem:[%s2846_s1 + $0x150] sm:$0xff]  ;;  %v1174_v28 = vld [vmem:[%s2846_s1 + $0x358] sm:$0xff] }
  0x1a   :  { %1824 = vmatpush3.bf16.msra.mxu1 %v1823_v46  ;;  %2112 = vset.pattern.permute.xlu1 %v2126_v60  ;;  %v1946_v46 = vpack.c.bf16 %v1158_v43, %v1157_v42  ;;  %v1103_v31 = vld [vmem:[%s2846_s1 + $0x160] sm:$0xff]  ;;  %v1176_v34 = vld [vmem:[%s2846_s1 + $0x368] sm:$0xff]  ;;  %v1105_v37 = vld [vmem:[%s2846_s1 + $0x170] sm:$0xff] }
  0x1b   :  { %1920 = vmatpush3.bf16.msra.mxu0 %v1919_v47  ;;  %1825 = vmatprep.subr.bf16.mxu1 %v2116_v7  ;;  %v1087_v47 = vld [vmem:[%s2846_s1 + $0xf0] sm:$0xff]  ;;  %v1178_v40 = vld [vmem:[%s2846_s1 + $0x378] sm:$0xff]  ;;  %v1109_v43 = vld [vmem:[%s2846_s1 + $0x180] sm:$0xff] }
  0x1c   :  { %1921 = vmatprep.subr.bf16.mxu0 %v2116_v7  ;;  %877 = vperm.xlu1 %2112, %v2161_v2   ;;  %v1832_v2 = vpack.c.bf16 %v1074_v63, %v1073_v62  ;;  %v1853_v51 = vpack.c.bf16 %v1088_v48, %v1087_v47  ;;  %v1094_v62 = vld [vmem:[%s2846_s1 + $0x118] sm:$0xff]  ;;  %v1165_v63 = vld [vmem:[%s2846_s1 + $0x310] sm:$0xff]  ;;  %v1181_v47 = vld [vmem:[%s2846_s1 + $0x380] sm:$0xff] }
  0x1d   :  { %v1859_v1 = vpack.c.bf16 %v1094_v62, %v1093_v61  ;;  %v1182_v48 = vld [vmem:[%s2846_s1 + $0x388] sm:$0xff]  ;;  %v1115_v62 = vld [vmem:[%s2846_s1 + $0x1b0] sm:$0xff] }
  0x1e   :  { %1827 = vmatpush3.bf16.msra.mxu1 %v1826_v52  ;;  %v1949_v52 = vpack.c.bf16 %v1160_v50, %v1159_v49  ;;  %v1976_v50 = vpack.c.bf16 %v1182_v48, %v1181_v47  ;;  %v1207_v47 = vld [vmem:[%s2846_s1 + $0x440] sm:$0xff]  ;;  %v1208_v48 = vld [vmem:[%s2846_s1 + $0x448] sm:$0xff] }
  0x1f   :  { %1923 = vmatpush3.bf16.msra.mxu0 %v1922_v53  ;;  %1828 = vmatprep.subr.bf16.mxu1 %v2116_v7  ;;  %v1091_v53 = vld [vmem:[%s2846_s1 + $0x100] sm:$0xff] }
  0x20   :  { %1924 = vmatprep.subr.bf16.mxu0 %v2116_v7 }
  0x22   :  { %1830 = vmatpush3.bf16.msra.mxu1 %v1829_v58  ;;  %v1164_v58 = vld [vmem:[%s2846_s1 + $0x308] sm:$0xff] }
  0x23   :  { %1926 = vmatpush3.bf16.msra.mxu0 %v1925_v59  ;;  %1831 = vmatprep.subr.bf16.mxu1 %v2116_v7  ;;  %v1856_v59 = vpack.c.bf16 %v1092_v54, %v1091_v53  ;;  %v1952_v60 = vpack.c.bf16 %v1164_v58, %v1163_v57  ;;  %v1184_v53 = vld [vmem:[%s2846_s1 + $0x398] sm:$0xff]  ;;  %v1114_v57 = vld [vmem:[%s2846_s1 + $0x1a8] sm:$0xff]  ;;  %v1185_v58 = vld [vmem:[%s2846_s1 + $0x3a0] sm:$0xff] }
  0x24   :  { %1927 = vmatprep.subr.bf16.mxu0 %v2116_v7 }
  0x81   :  { %v33_v6 = vpop.permute.xlu1 %32  ;;  %v408_v8 = vpop.permute.xlu0 %407 }
  0x82   :  { %vm34_vm1 = vcmp.eq.s32.totalorder %v33_v6, %v2303_v3  ;;  %vm409_vm2 = vcmp.eq.s32.totalorder %v408_v8, %v2303_v3  ;;  %v1167_v6 = vld [vmem:[%s2846_s1 + $0x320] sm:$0xff]  ;;  %v1168_v8 = vld [vmem:[%s2846_s1 + $0x328] sm:$0xff] }
  0x83   :  { %1455 = vmatmul.mubr.msk.f32.vlgmr.msra.gmra.mrb[0].mxu1 %vm34_vm1, %v2127_v12  ;;  %1595 = vmatmul.mubr.msk.f32.vlgmr.msra.gmra.mrb[0].mxu0 %vm409_vm2, %v2127_v12  ;;  %v1958_v10 = vpack.c.bf16 %v1168_v8, %v1167_v6  ;;  %v1118_v6 = vld [vmem:[%s2846_s1 + $0x1c8] sm:$0xff]  ;;  %v1189_v8 = vld [vmem:[%s2846_s1 + $0x3c0] sm:$0xff] }
  0x84   :  { %1833 = vmatpush3.bf16.msra.mxu1 %v1832_v2  ;;  %1929 = vmatpush3.bf16.msra.mxu0 %v1928_v4  ;;  %v1955_v2 = vpack.c.bf16 %v1166_v0, %v1165_v63  ;;  %v1095_v4 = vld [vmem:[%s2846_s1 + $0x120] sm:$0xff]  ;;  %v1116_v63 = vld [vmem:[%s2846_s1 + $0x1b8] sm:$0xff]  ;;  %v1187_v0 = vld [vmem:[%s2846_s1 + $0x3b0] sm:$0xff] }
  0x85   :  { %1834 = vmatprep.subr.bf16.mxu1 %v2116_v7  ;;  %1930 = vmatprep.subr.bf16.mxu0 %v2116_v7  ;;  %v1862_v9 = vpack.c.bf16 %v1096_v5, %v1095_v4  ;;  %v1117_v5 = vld [vmem:[%s2846_s1 + $0x1c0] sm:$0xff] }
  0x86   :  { %1489 = vmatprep.mubr.msk.f32.mxu1 %vm2117_vm0, %v2118_v14  ;;  %1629 = vmatprep.mubr.msk.f32.mxu0 %vm2117_vm0, %v2118_v14  ;;  %v2395_v44 = vpop.permute.xlu1 %595 }
  0x87   :  { %v502_v56 = vpop.permute.xlu0 %501  ;;  %vm597_vm5 = vcmp.eq.s32.totalorder %v2395_v44, %v2303_v3  ;;  %v1183_v44 = vld [vmem:[%s2846_s1 + $0x390] sm:$0xff] }
  0x88   :  { %1836 = vmatpush3.bf16.msra.mxu1 %v1835_v13  ;;  %1932 = vmatpush3.bf16.msra.mxu0 %v1931_v15  ;;  %vm503_vm4 = vcmp.eq.s32.totalorder %v502_v56, %v2303_v3  ;;  %v1098_v13 = vld [vmem:[%s2846_s1 + $0x138] sm:$0xff]  ;;  %v1169_v15 = vld [vmem:[%s2846_s1 + $0x330] sm:$0xff]  ;;  %v1113_v56 = vld [vmem:[%s2846_s1 + $0x1a0] sm:$0xff] }
  0x89   :  { %1837 = vmatprep.subr.bf16.mxu1 %v2116_v7  ;;  %1933 = vmatprep.subr.bf16.mxu0 %v2116_v7  ;;  %v1865_v17 = vpack.c.bf16 %v1098_v13, %v1097_v11  ;;  %v1961_v18 = vpack.c.bf16 %v1170_v16, %v1169_v15  ;;  %v1119_v13 = vld [vmem:[%s2846_s1 + $0x1d0] sm:$0xff]  ;;  %v1120_v15 = vld [vmem:[%s2846_s1 + $0x1d8] sm:$0xff] }
  0x8a   :  { %v1191_v16 = vld [vmem:[%s2846_s1 + $0x3d0] sm:$0xff] }
  0x8b   :  { %v126_v55 = vpop.permute.xlu1 %125 }
  0x8c   :  { %1839 = vmatpush3.bf16.msra.mxu1 %v1838_v20  ;;  %1935 = vmatpush3.bf16.msra.mxu0 %v1934_v21  ;;  %vm127_vm3 = vcmp.eq.s32.totalorder %v126_v55, %v2303_v3  ;;  %v1100_v20 = vld [vmem:[%s2846_s1 + $0x148] sm:$0xff]  ;;  %v1171_v21 = vld [vmem:[%s2846_s1 + $0x340] sm:$0xff]  ;;  %v1979_v55 = vpack.c.bf16 %v1184_v53, %v1183_v44 }
  0x8d   :  { %1840 = vmatprep.subr.bf16.mxu1 %v2116_v7  ;;  %1936 = vmatprep.subr.bf16.mxu0 %v2116_v7  ;;  %v1868_v23 = vpack.c.bf16 %v1100_v20, %v1099_v19  ;;  %v1964_v24 = vpack.c.bf16 %v1172_v22, %v1171_v21  ;;  %v1121_v20 = vld [vmem:[%s2846_s1 + $0x1e0] sm:$0xff]  ;;  %v1122_v21 = vld [vmem:[%s2846_s1 + $0x1e8] sm:$0xff] }
  0x8e   :  { %v1193_v22 = vld [vmem:[%s2846_s1 + $0x3e0] sm:$0xff]  ;;  %v1212_v53 = vld [vmem:[%s2846_s1 + $0x468] sm:$0xff] }
  0x8f   :  { %v1211_v44 = vld [vmem:[%s2846_s1 + $0x460] sm:$0xff] }
  0x90   :  { %1842 = vmatpush3.bf16.msra.mxu1 %v1841_v26  ;;  %1938 = vmatpush3.bf16.msra.mxu0 %v1937_v27  ;;  %v1102_v26 = vld [vmem:[%s2846_s1 + $0x158] sm:$0xff]  ;;  %v1173_v27 = vld [vmem:[%s2846_s1 + $0x350] sm:$0xff] }
  0x91   :  { %1843 = vmatprep.subr.bf16.mxu1 %v2116_v7  ;;  %1939 = vmatprep.subr.bf16.mxu0 %v2116_v7  ;;  %v1871_v29 = vpack.c.bf16 %v1102_v26, %v1101_v25  ;;  %v1967_v30 = vpack.c.bf16 %v1174_v28, %v1173_v27  ;;  %v1898_v25 = vpack.c.bf16 %v1122_v21, %v1121_v20  ;;  %v1123_v27 = vld [vmem:[%s2846_s1 + $0x1f0] sm:$0xff]  ;;  %v1124_v28 = vld [vmem:[%s2846_s1 + $0x1f8] sm:$0xff] }
  0x92   :  { %v1232_v20 = vld [vmem:[%s2846_s1 + $0x4f8] sm:$0xff] }
  0x94   :  { %1845 = vmatpush3.bf16.msra.mxu1 %v1844_v32  ;;  %1941 = vmatpush3.bf16.msra.mxu0 %v1940_v33  ;;  %v1104_v32 = vld [vmem:[%s2846_s1 + $0x168] sm:$0xff]  ;;  %v1175_v33 = vld [vmem:[%s2846_s1 + $0x360] sm:$0xff] }
  0x95   :  { %1846 = vmatprep.subr.bf16.mxu1 %v2116_v7  ;;  %1942 = vmatprep.subr.bf16.mxu0 %v2116_v7  ;;  %v1874_v35 = vpack.c.bf16 %v1104_v32, %v1103_v31  ;;  %v1970_v36 = vpack.c.bf16 %v1176_v34, %v1175_v33  ;;  %v1901_v31 = vpack.c.bf16 %v1124_v28, %v1123_v27  ;;  %v1199_v34 = vld [vmem:[%s2846_s1 + $0x400] sm:$0xff]  ;;  %v974_v27 = vld [vmem:[%s2847_s3 + $0x18] sm:$0xff]  ;;  %v976_v28 = vld [vmem:[%s2847_s3 + $0x28] sm:$0xff] }
  0x98   :  { %1848 = vmatpush3.bf16.msra.mxu1 %v1847_v38  ;;  %1944 = vmatpush3.bf16.msra.mxu0 %v1943_v39  ;;  %v1106_v38 = vld [vmem:[%s2846_s1 + $0x178] sm:$0xff]  ;;  %v1177_v39 = vld [vmem:[%s2846_s1 + $0x370] sm:$0xff] }
  0x99   :  { %1849 = vmatprep.subr.bf16.mxu1 %v2116_v7  ;;  %1945 = vmatprep.subr.bf16.mxu0 %v2116_v7  ;;  %v1877_v41 = vpack.c.bf16 %v1106_v38, %v1105_v37  ;;  %v1973_v42 = vpack.c.bf16 %v1178_v40, %v1177_v39  ;;  %v1201_v37 = vld [vmem:[%s2846_s1 + $0x410] sm:$0xff]  ;;  %v1202_v38 = vld [vmem:[%s2846_s1 + $0x418] sm:$0xff]  ;;  %v1203_v40 = vld [vmem:[%s2846_s1 + $0x420] sm:$0xff] }
  0x9a   :  { %v2003_v39 = vpack.c.bf16 %v1202_v38, %v1201_v37  ;;  %v982_v37 = vld [vmem:[%s2847_s3 + $0x58] sm:$0xff] }
  0x9c   :  { %1851 = vmatpush3.bf16.msra.mxu1 %v1850_v45  ;;  %1947 = vmatpush3.bf16.msra.mxu0 %v1946_v46  ;;  %v1110_v45 = vld [vmem:[%s2846_s1 + $0x188] sm:$0xff]  ;;  %v220_v46 = vpop.permute.xlu1 %219 }
  0x9d   :  { %1852 = vmatprep.subr.bf16.mxu1 %v2116_v7  ;;  %1948 = vmatprep.subr.bf16.mxu0 %v2116_v7  ;;  %v1880_v49 = vpack.c.bf16 %v1110_v45, %v1109_v43  ;;  %vm221_vm6 = vcmp.eq.s32.totalorder %v220_v46, %v2303_v3  ;;  %v1205_v43 = vld [vmem:[%s2846_s1 + $0x430] sm:$0xff]  ;;  %v1206_v45 = vld [vmem:[%s2846_s1 + $0x438] sm:$0xff] }
  0x9e   :  { %v2009_v46 = vpack.c.bf16 %v1206_v45, %v1205_v43  ;;  %v986_v43 = vld [vmem:[%s2847_s3 + $0x78] sm:$0xff] }
  0xa0   :  { %1854 = vmatpush3.bf16.msra.mxu1 %v1853_v51  ;;  %1950 = vmatpush3.bf16.msra.mxu0 %v1949_v52  ;;  %v1111_v51 = vld [vmem:[%s2846_s1 + $0x190] sm:$0xff]  ;;  %v1112_v52 = vld [vmem:[%s2846_s1 + $0x198] sm:$0xff] }
  0xa1   :  { %1855 = vmatprep.subr.bf16.mxu1 %v2116_v7  ;;  %1951 = vmatprep.subr.bf16.mxu0 %v2116_v7  ;;  %v1883_v54 = vpack.c.bf16 %v1112_v52, %v1111_v51  ;;  %v1210_v51 = vld [vmem:[%s2846_s1 + $0x458] sm:$0xff] }
  0xa3   :  { %1490 = vmatmul.mubr.msk.f32.vlgmr.msra.gmra.mrb[0].mxu1 %vm127_vm3, %v2127_v12  ;;  %1630 = vmatmul.mubr.msk.f32.vlgmr.msra.gmra.mrb[0].mxu0 %vm503_vm4, %v2127_v12 }
  0xa4   :  { %1857 = vmatpush3.bf16.msra.mxu1 %v1856_v59  ;;  %1953 = vmatpush3.bf16.msra.mxu0 %v1952_v60  ;;  %v1186_v59 = vld [vmem:[%s2846_s1 + $0x3a8] sm:$0xff]  ;;  %v1886_v60 = vpack.c.bf16 %v1114_v57, %v1113_v56  ;;  %v1214_v56 = vld [vmem:[%s2846_s1 + $0x478] sm:$0xff] }
  0xa5   :  { %1858 = vmatprep.subr.bf16.mxu1 %v2116_v7  ;;  %1954 = vmatprep.subr.bf16.mxu0 %v2116_v7  ;;  %v1982_v61 = vpack.c.bf16 %v1186_v59, %v1185_v58  ;;  %v784_v58 = vpop.permute.xlu1 %783  ;;  %v1217_v59 = vld [vmem:[%s2846_s1 + $0x480] sm:$0xff] }
  0xa6   :  { %1524 = vmatprep.mubr.msk.f32.mxu1 %vm2117_vm0, %v2118_v14  ;;  %1664 = vmatprep.mubr.msk.f32.mxu0 %vm2117_vm0, %v2118_v14  ;;  %vm785_vm9 = vcmp.eq.s32.totalorder %v784_v58, %v2303_v3 }
  0xa8   :  { %1860 = vmatpush3.bf16.msra.mxu1 %v1859_v1  ;;  %1956 = vmatpush3.bf16.msra.mxu0 %v1955_v2  ;;  %v1188_v1 = vld [vmem:[%s2846_s1 + $0x3b8] sm:$0xff]  ;;  %v1889_v2 = vpack.c.bf16 %v1116_v63, %v1115_v62  ;;  %v1219_v62 = vld [vmem:[%s2846_s1 + $0x490] sm:$0xff] }
  0xa9   :  { %1861 = vmatprep.subr.bf16.mxu1 %v2116_v7  ;;  %1957 = vmatprep.subr.bf16.mxu0 %v2116_v7  ;;  %v1985_v4 = vpack.c.bf16 %v1188_v1, %v1187_v0  ;;  %v1220_v63 = vld [vmem:[%s2846_s1 + $0x498] sm:$0xff]  ;;  %v1221_v1 = vld [vmem:[%s2846_s1 + $0x4a0] sm:$0xff] }
  0xaa   :  { %v2027_v0 = vpack.c.bf16 %v1220_v63, %v1219_v62 }
  0xac   :  { %1863 = vmatpush3.bf16.msra.mxu1 %v1862_v9  ;;  %1959 = vmatpush3.bf16.msra.mxu0 %v1958_v10  ;;  %v1190_v9 = vld [vmem:[%s2846_s1 + $0x3c8] sm:$0xff]  ;;  %v1892_v10 = vpack.c.bf16 %v1118_v6, %v1117_v5  ;;  %v1223_v5 = vld [vmem:[%s2846_s1 + $0x4b0] sm:$0xff] }
  0xad   :  { %1864 = vmatprep.subr.bf16.mxu1 %v2116_v7  ;;  %1960 = vmatprep.subr.bf16.mxu0 %v2116_v7  ;;  %v1988_v11 = vpack.c.bf16 %v1190_v9, %v1189_v8  ;;  %v1225_v8 = vld [vmem:[%s2846_s1 + $0x4c0] sm:$0xff]  ;;  %v1226_v9 = vld [vmem:[%s2846_s1 + $0x4c8] sm:$0xff] }
  0xb0   :  { %1866 = vmatpush3.bf16.msra.mxu1 %v1865_v17  ;;  %1962 = vmatpush3.bf16.msra.mxu0 %v1961_v18  ;;  %v1192_v17 = vld [vmem:[%s2846_s1 + $0x3d8] sm:$0xff]  ;;  %v1895_v18 = vpack.c.bf16 %v1120_v15, %v1119_v13 }
  0xb1   :  { %1867 = vmatprep.subr.bf16.mxu1 %v2116_v7  ;;  %1963 = vmatprep.subr.bf16.mxu0 %v2116_v7  ;;  %v1991_v19 = vpack.c.bf16 %v1192_v17, %v1191_v16  ;;  %v1228_v13 = vld [vmem:[%s2846_s1 + $0x4d8] sm:$0xff]  ;;  %v1229_v16 = vld [vmem:[%s2846_s1 + $0x4e0] sm:$0xff]  ;;  %v1230_v17 = vld [vmem:[%s2846_s1 + $0x4e8] sm:$0xff] }
  0xb4   :  { %1869 = vmatpush3.bf16.msra.mxu1 %v1868_v23  ;;  %1965 = vmatpush3.bf16.msra.mxu0 %v1964_v24  ;;  %v1194_v23 = vld [vmem:[%s2846_s1 + $0x3e8] sm:$0xff]  ;;  %v690_v24 = vpop.permute.xlu0 %689 }
  0xb5   :  { %1870 = vmatprep.subr.bf16.mxu1 %v2116_v7  ;;  %1966 = vmatprep.subr.bf16.mxu0 %v2116_v7  ;;  %v1994_v26 = vpack.c.bf16 %v1194_v23, %v1193_v22  ;;  %vm691_vm7 = vcmp.eq.s32.totalorder %v690_v24, %v2303_v3  ;;  %v878_v22 = vpop.permute.xlu1 %877  ;;  %v971_v23 = vld [vmem:[%s2847_s3] sm:$0xff]  ;;  %v972_v24 = vld [vmem:[%s2847_s3 + $0x8] sm:$0xff] }
  0xb6   :  { %vm879_vm10 = vcmp.eq.s32.totalorder %v878_v22, %v2303_v3 }
  0xb8   :  { %1872 = vmatpush3.bf16.msra.mxu1 %v1871_v29  ;;  %1968 = vmatpush3.bf16.msra.mxu0 %v1967_v30  ;;  %v1195_v29 = vld [vmem:[%s2846_s1 + $0x3f0] sm:$0xff]  ;;  %v1196_v30 = vld [vmem:[%s2846_s1 + $0x3f8] sm:$0xff]  ;;  %v314_v33 = vpop.permute.xlu0 %313 }
  0xb9   :  { %1873 = vmatprep.subr.bf16.mxu1 %v2116_v7  ;;  %1969 = vmatprep.subr.bf16.mxu0 %v2116_v7  ;;  %v1997_v32 = vpack.c.bf16 %v1196_v30, %v1195_v29  ;;  %vm315_vm8 = vcmp.eq.s32.totalorder %v314_v33, %v2303_v3  ;;  %v977_v30 = vld [vmem:[%s2847_s3 + $0x30] sm:$0xff]  ;;  %v979_v33 = vld [vmem:[%s2847_s3 + $0x40] sm:$0xff] }
  0xbc   :  { %1875 = vmatpush3.bf16.msra.mxu1 %v1874_v35  ;;  %1971 = vmatpush3.bf16.msra.mxu0 %v1970_v36  ;;  %v1200_v35 = vld [vmem:[%s2846_s1 + $0x408] sm:$0xff] }
  0xbd   :  { %1876 = vmatprep.subr.bf16.mxu1 %v2116_v7  ;;  %1972 = vmatprep.subr.bf16.mxu0 %v2116_v7  ;;  %v2000_v36 = vpack.c.bf16 %v1200_v35, %v1199_v34  ;;  %v980_v34 = vld [vmem:[%s2847_s3 + $0x48] sm:$0xff] }
  0xbe   :  { %v2060_v35 = vpack.c.bf16 %v980_v34, %v979_v33 }
  0xc0   :  { %1878 = vmatpush3.bf16.msra.mxu1 %v1877_v41  ;;  %1974 = vmatpush3.bf16.msra.mxu0 %v1973_v42  ;;  %v1204_v41 = vld [vmem:[%s2846_s1 + $0x428] sm:$0xff] }
  0xc1   :  { %1879 = vmatprep.subr.bf16.mxu1 %v2116_v7  ;;  %1975 = vmatprep.subr.bf16.mxu0 %v2116_v7  ;;  %v2006_v42 = vpack.c.bf16 %v1204_v41, %v1203_v40  ;;  %v984_v40 = vld [vmem:[%s2847_s3 + $0x68] sm:$0xff] }
  0xc3   :  { %1525 = vmatmul.mubr.msk.f32.vlgmr.msra.gmra.mrb[0].mxu1 %vm221_vm6, %v2127_v12  ;;  %1665 = vmatmul.mubr.msk.f32.vlgmr.msra.gmra.mrb[0].mxu0 %vm597_vm5, %v2127_v12 }
  0xc4   :  { %1881 = vmatpush3.bf16.msra.mxu1 %v1880_v49  ;;  %1977 = vmatpush3.bf16.msra.mxu0 %v1976_v50  ;;  %v2012_v49 = vpack.c.bf16 %v1208_v48, %v1207_v47  ;;  %v1209_v50 = vld [vmem:[%s2846_s1 + $0x450] sm:$0xff]  ;;  %v1069_v48 = vld [vmem:[%s2848_s2] ss:$0 sm:$0xff] }
  0xc5   :  { %1882 = vmatprep.subr.bf16.mxu1 %v2116_v7  ;;  %1978 = vmatprep.subr.bf16.mxu0 %v2116_v7  ;;  %v2015_v52 = vpack.c.bf16 %v1210_v51, %v1209_v50 }
  0xc6   :  { %1559 = vmatprep.mubr.msk.f32.mxu1 %vm2117_vm0, %v2118_v14  ;;  %1699 = vmatprep.mubr.msk.f32.mxu0 %vm2117_vm0, %v2118_v14 }
  0xc8   :  { %1884 = vmatpush3.bf16.msra.mxu1 %v1883_v54  ;;  %1980 = vmatpush3.bf16.msra.mxu0 %v1979_v55  ;;  %v2018_v54 = vpack.c.bf16 %v1212_v53, %v1211_v44  ;;  %v1213_v55 = vld [vmem:[%s2846_s1 + $0x470] sm:$0xff]  ;;  %v1234_v44 = vld [vmem:[%s2849_s4] ss:$0 sm:$0xff] }
  0xc9   :  { %1885 = vmatprep.subr.bf16.mxu1 %v2116_v7  ;;  %1981 = vmatprep.subr.bf16.mxu0 %v2116_v7  ;;  %v2021_v57 = vpack.c.bf16 %v1214_v56, %v1213_v55 }
  0xcc   :  { %1887 = vmatpush3.bf16.msra.mxu1 %v1886_v60  ;;  %1983 = vmatpush3.bf16.msra.mxu0 %v1982_v61  ;;  %v1218_v60 = vld [vmem:[%s2846_s1 + $0x488] sm:$0xff] }
  0xcd   :  { %1888 = vmatprep.subr.bf16.mxu1 %v2116_v7  ;;  %1984 = vmatprep.subr.bf16.mxu0 %v2116_v7  ;;  %v2024_v61 = vpack.c.bf16 %v1218_v60, %v1217_v59 }
  0xd0   :  { %1890 = vmatpush3.bf16.msra.mxu1 %v1889_v2  ;;  %1986 = vmatpush3.bf16.msra.mxu0 %v1985_v4  ;;  %v1222_v2 = vld [vmem:[%s2846_s1 + $0x4a8] sm:$0xff] }
  0xd1   :  { %1891 = vmatprep.subr.bf16.mxu1 %v2116_v7  ;;  %1987 = vmatprep.subr.bf16.mxu0 %v2116_v7  ;;  %v2030_v4 = vpack.c.bf16 %v1222_v2, %v1221_v1 }
  0xd4   :  { %1893 = vmatpush3.bf16.msra.mxu1 %v1892_v10  ;;  %1989 = vmatpush3.bf16.msra.mxu0 %v1988_v11  ;;  %v2036_v10 = vpack.c.bf16 %v1226_v9, %v1225_v8  ;;  %v1227_v11 = vld [vmem:[%s2846_s1 + $0x4d0] sm:$0xff] }
  0xd5   :  { %1894 = vmatprep.subr.bf16.mxu1 %v2116_v7  ;;  %1990 = vmatprep.subr.bf16.mxu0 %v2116_v7  ;;  %v2039_v15 = vpack.c.bf16 %v1228_v13, %v1227_v11 }
  0xd8   :  { %1896 = vmatpush3.bf16.msra.mxu1 %v1895_v18  ;;  %1992 = vmatpush3.bf16.msra.mxu0 %v1991_v19  ;;  %v2042_v18 = vpack.c.bf16 %v1230_v17, %v1229_v16  ;;  %v1231_v19 = vld [vmem:[%s2846_s1 + $0x4f0] sm:$0xff] }
  0xd9   :  { %1897 = vmatprep.subr.bf16.mxu1 %v2116_v7  ;;  %1993 = vmatprep.subr.bf16.mxu0 %v2116_v7  ;;  %v2045_v21 = vpack.c.bf16 %v1232_v20, %v1231_v19 }
  0xdc   :  { %1899 = vmatpush3.bf16.msra.mxu1 %v1898_v25  ;;  %1995 = vmatpush3.bf16.msra.mxu0 %v1994_v26  ;;  %v973_v25 = vld [vmem:[%s2847_s3 + $0x10] sm:$0xff]  ;;  %v2048_v26 = vpack.c.bf16 %v972_v24, %v971_v23 }
  0xdd   :  { %1900 = vmatprep.subr.bf16.mxu1 %v2116_v7  ;;  %1996 = vmatprep.subr.bf16.mxu0 %v2116_v7  ;;  %v2051_v3 = vpack.c.bf16 %v974_v27, %v973_v25 }
  0xe0   :  { %1902 = vmatpush3.bf16.msra.mxu1 %v1901_v31  ;;  %1998 = vmatpush3.bf16.msra.mxu0 %v1997_v32  ;;  %v978_v31 = vld [vmem:[%s2847_s3 + $0x38] sm:$0xff] }
  0xe1   :  { %1999 = vmatprep.subr.bf16.mxu0 %v2116_v7  ;;  %2047 = vmatprep.subr.bf16.mxu1 %v2116_v7  ;;  %v2057_v32 = vpack.c.bf16 %v978_v31, %v977_v30 }
  0xe3   :  { %1560 = vmatmul.mubr.msk.f32.vlgmr.msra.gmra.mrb[0].mxu1 %vm315_vm8, %v2127_v12  ;;  %1700 = vmatmul.mubr.msk.f32.vlgmr.msra.gmra.mrb[0].mxu0 %vm691_vm7, %v2127_v12 }
  0xe4   :  { %2001 = vmatpush3.bf16.msra.mxu0 %v2000_v36  ;;  %1734 = vmatprep.mubr.msk.f32.mxu0 %vm2117_vm0, %v2118_v14  ;;  %v981_v36 = vld [vmem:[%s2847_s3 + $0x50] sm:$0xff] }
  0xe5   :  { %2002 = vmatprep.subr.bf16.mxu0 %v2116_v7  ;;  %1804 = vmatprep.mubr.msk.f32.mxu1 %vm2117_vm0, %v2118_v14  ;;  %v2063_v38 = vpack.c.bf16 %v982_v37, %v981_v36 }
  0xe6   :  { %2049 = vmatpush3.bf16.msra.mxu1 %v2048_v26 }
  0xe7   :  { %2050 = vmatprep.subr.bf16.mxu1 %v2116_v7 }
  0xe8   :  { %2004 = vmatpush3.bf16.msra.mxu0 %v2003_v39  ;;  %v983_v39 = vld [vmem:[%s2847_s3 + $0x60] sm:$0xff] }
  0xe9   :  { %2005 = vmatprep.subr.bf16.mxu0 %v2116_v7  ;;  %v2066_v41 = vpack.c.bf16 %v984_v40, %v983_v39 }
  0xea   :  { %2052 = vmatpush3.bf16.msra.mxu1 %v2051_v3 }
  0xeb   :  { %2053 = vmatprep.subr.bf16.mxu1 %v2116_v7 }
  0xec   :  { %2007 = vmatpush3.bf16.msra.mxu0 %v2006_v42  ;;  %v985_v42 = vld [vmem:[%s2847_s3 + $0x70] sm:$0xff] }
  0xed   :  { %2008 = vmatprep.subr.bf16.mxu0 %v2116_v7  ;;  %v2069_v45 = vpack.c.bf16 %v986_v43, %v985_v42 }
  0xf0   :  { %2010 = vmatpush3.bf16.msra.mxu0 %v2009_v46 }
  0xf1   :  { %2011 = vmatprep.subr.bf16.mxu0 %v2116_v7 }
  0xf4   :  { %2013 = vmatpush3.bf16.msra.mxu0 %v2012_v49 }
  0xf5   :  { %2014 = vmatprep.subr.bf16.mxu0 %v2116_v7 }
  0xf8   :  { %2016 = vmatpush3.bf16.msra.mxu0 %v2015_v52 }
  0xf9   :  { %2017 = vmatprep.subr.bf16.mxu0 %v2116_v7 }
  0xfc   :  { %2019 = vmatpush3.bf16.msra.mxu0 %v2018_v54 }
  0xfd   :  { %2020 = vmatprep.subr.bf16.mxu0 %v2116_v7 }
 0x100   :  { %2022 = vmatpush3.bf16.msra.mxu0 %v2021_v57 }
 0x101   :  { %2023 = vmatprep.subr.bf16.mxu0 %v2116_v7 }
 0x103   :  { %1735 = vmatmul.mubr.msk.f32.vlgmr.msra.gmra.mrb[0].mxu0 %vm785_vm9, %v2127_v12 }
 0x104   :  { %2025 = vmatpush3.bf16.msra.mxu0 %v2024_v61  ;;  %1769 = vmatprep.mubr.msk.f32.mxu0 %vm2117_vm0, %v2118_v14  ;;  %v1224_v14 = vld [vmem:[%s2846_s1 + $0x4b8] sm:$0xff] }
 0x105   :  { %2026 = vmatprep.subr.bf16.mxu0 %v2116_v7  ;;  %v2033_v6 = vpack.c.bf16 %v1224_v14, %v1223_v5 }
 0x108   :  { %2028 = vmatpush3.bf16.msra.mxu0 %v2027_v0 }
 0x109   :  { %2029 = vmatprep.subr.bf16.mxu0 %v2116_v7 }
 0x10c   :  { %2031 = vmatpush3.bf16.msra.mxu0 %v2030_v4 }
 0x10d   :  { %2032 = vmatprep.subr.bf16.mxu0 %v2116_v7 }
 0x110   :  { %2034 = vmatpush3.bf16.msra.mxu0 %v2033_v6 }
 0x111   :  { %2035 = vmatprep.subr.bf16.mxu0 %v2116_v7 }
 0x114   :  { %2037 = vmatpush3.bf16.msra.mxu0 %v2036_v10 }
 0x115   :  { %2038 = vmatprep.subr.bf16.mxu0 %v2116_v7 }
 0x118   :  { %2040 = vmatpush3.bf16.msra.mxu0 %v2039_v15 }
 0x119   :  { %2041 = vmatprep.subr.bf16.mxu0 %v2116_v7 }
 0x11c   :  { %2043 = vmatpush3.bf16.msra.mxu0 %v2042_v18 }
 0x11d   :  { %2044 = vmatprep.subr.bf16.mxu0 %v2116_v7 }
 0x120   :  { %2046 = vmatpush3.bf16.msra.mxu0 %v2045_v21 }
 0x123   :  { %1770 = vmatmul.mubr.msk.f32.vlgmr.msra.gmra.mrb[0].mxu0 %vm879_vm10, %v2127_v12  ;;  %v975_v12 = vld [vmem:[%s2847_s3 + $0x20] sm:$0xff] }
 0x124   :  { %v2054_v29 = vpack.c.bf16 %v976_v28, %v975_v12 }
 0x126   :  { %2055 = vmatpush3.bf16.msra.mxu1 %v2054_v29 }
 0x127   :  { %2056 = vmatprep.subr.bf16.mxu1 %v2116_v7 }
 0x12a   :  { %2058 = vmatpush3.bf16.msra.mxu1 %v2057_v32 }
 0x12b   :  { %2059 = vmatprep.subr.bf16.mxu1 %v2116_v7 }
 0x12e   :  { %2061 = vmatpush3.bf16.msra.mxu1 %v2060_v35 }
 0x12f   :  { %2062 = vmatprep.subr.bf16.mxu1 %v2116_v7 }
 0x132   :  { %2064 = vmatpush3.bf16.msra.mxu1 %v2063_v38 }
 0x133   :  { %2065 = vmatprep.subr.bf16.mxu1 %v2116_v7 }
 0x136   :  { %2067 = vmatpush3.bf16.msra.mxu1 %v2066_v41 }
 0x137   :  { %2068 = vmatprep.subr.bf16.mxu1 %v2116_v7 }
 0x13a   :  { %2070 = vmatpush3.bf16.msra.mxu1 %v2069_v45 }
 0x1b6   :  { %v401_v46 = vpop.f32.mrb[0].mxu1 }
 0x1b7   :  { %v1561_v47 = vpop.f32.mrb[1].mxu1  ;;  %v2071_v49 = vadd.f32 %v1069_v48, %v401_v46 }
 0x1f6   :  { %v965_v50 = vpop.f32.mrb[0].mxu0 }
 0x1f7   :  { %v2072_v51 = vadd.f32 %v2071_v49, %v965_v50  ;;  %v1771_v7 = vpop.f32.mrb[1].mxu0 }
 0x1f9   :  { %v970_v52 = vmax.f32 %v2072_v51, 0.0 }
 0x1fb   :  { %1805 = vmatmul.mubr.f32.vlgmr.msra.gmra.mrb[2].mxu1 %v970_v52 }
 0x2ce   :  { %v1060_v53 = vpop.f32.mrb[2].mxu1 }
 0x2cf   :  { %v1061_v54 = vadd.f32 %v1234_v44, %v1060_v53  ;;  %v1806_v55 = vpop.f32.mrb[3].mxu1 }
 0x2d1   :  { %1064 = vst [vmem:[%s2850_s5] sm:$0xff] %v1061_v54 }

</bundles_post_ra>
